<compile_context>
chip_gen: v7x
topology: tpu7x:2x2x1
jax: 0.10.0
libtpu: 0.0.40
codegen_flags: <defaults>
</compile_context>

<pallas_src>
import functools

import jax
import jax.numpy as jnp
from jax.experimental import pallas as pl
from jax.experimental.pallas import tpu as pltpu

_VMEM_LIMIT_BYTES = 32 * 1024 * 1024   # safe on v5e/v6e (128 MiB) and v7x (64 MiB)


def _round_up(x, m):
    return (x + m - 1) // m * m


def _conv_stats_kernel(*refs, KH, KW, Wp, Wo, has_nonlinear, add_bias):
    """Pass 1: ReLU -> conv (single im2col matmul) -> partial BN statistics.

    refs (add_bias=True):  x_ref, w_ref, b_ref, y_ref, sum_ref, sq_ref
    refs (add_bias=False): x_ref, w_ref,        y_ref, sum_ref, sq_ref

      x_ref : (1, Cin_pad, Hp*Wp + KW-1) f32   spatially-flattened padded image
      w_ref : (Cpad, KH*KW*Cin_pad)      bf16  im2col weight matrix
      b_ref : (Cpad, 1)                  f32   conv bias (only when no BN)
      y_ref : (1, Cpad, L=Ho*Wp)         f32   conv output slab (channel-major)
      sum_ref, sq_ref : (1, Cpad, 1)     f32   per-channel sum / sum-of-squares
    """
    if add_bias:
        x_ref, w_ref, b_ref, y_ref, sum_ref, sq_ref = refs
    else:
        x_ref, w_ref, y_ref, sum_ref, sq_ref = refs
        b_ref = None

    L = y_ref.shape[2]          # Ho * Wp

    # Conv tap (kh, kw) == columns [kh*Wp + kw, kh*Wp + kw + L) of the
    # flattened image: pure lane-offset windows (no gather / H,W relayout).
    taps = []
    for kh in range(KH):
        for kw in range(KW):
            off = kh * Wp + kw
            taps.append(x_ref[0, :, off:off + L])        # (Cin_pad, L) f32
    patches = jnp.concatenate(taps, axis=0)              # (KH*KW*Cin_pad, L)
    if has_nonlinear:
        patches = jnp.maximum(patches, 0.0)              # ReLU in f32 (VPU)

    # Single MXU matmul: (Cpad, K) @ (K, L), bf16 operands, f32 accumulation.
    acc = jnp.dot(w_ref[...], patches.astype(jnp.bfloat16),
                  preferred_element_type=jnp.float32)    # (Cpad, L) f32
    if add_bias:
        acc = acc + b_ref[...]                           # (Cpad, 1) broadcast

    y_ref[0] = acc

    # Per-channel partial sums over valid output columns only: columns with
    # (p mod Wp) >= Wo are wrap-around junk from the flattened-width trick.
    col = jax.lax.broadcasted_iota(jnp.int32, (1, L), 1)
    valid = (col % Wp) < Wo
    accv = jnp.where(valid, acc, 0.0)
    sum_ref[0] = jnp.sum(accv, axis=1, keepdims=True)
    sq_ref[0] = jnp.sum(accv * accv, axis=1, keepdims=True)


def _bn_apply_kernel(y_ref, scale_ref, shift_ref, o_ref):
    """Pass 2: o = y * scale + shift, per-channel scale/shift (lane broadcast)."""
    o_ref[0] = y_ref[0] * scale_ref[...] + shift_ref[...]


def subrcb_forward(x_nchw, w_oihw, bias, *, padding=0, has_nonlinear=True,
                   has_bn=True, eps=1e-5):
    """NCHW forward of SubRCB (stride=1, symmetric integer padding)."""
    # TODO(synk): stride > 1 not implemented (module default stride=1).
    Cout, Cin, KH, KW = w_oihw.shape
    N = x_nchw.shape[0]

    x = x_nchw.astype(jnp.float32)
    if padding:
        x = jnp.pad(x, ((0, 0), (0, 0), (padding, padding), (padding, padding)))
    _, _, Hp, Wp = x.shape
    Ho, Wo = Hp - KH + 1, Wp - KW + 1
    L = Ho * Wp                        # flat output columns (KW-1 junk per row)

    Cin_pad = _round_up(Cin, 8)        # sublane-aligned channel blocks
    Cpad = _round_up(Cout, 8)
    K = KH * KW * Cin_pad
    Sp = Hp * Wp + (KW - 1)            # flat spatial + tail pad for largest tap

    # --- layout plumbing: cheap reshapes/zero-pads, no transposes ---
    if Cin_pad > Cin:
        x = jnp.pad(x, ((0, 0), (0, Cin_pad - Cin), (0, 0), (0, 0)))
    x_flat = jnp.pad(x.reshape(N, Cin_pad, Hp * Wp),
                     ((0, 0), (0, 0), (0, KW - 1)))

    w2 = jnp.transpose(w_oihw.astype(jnp.float32), (0, 2, 3, 1))  # (Cout,KH,KW,Cin)
    w2 = jnp.pad(w2, ((0, Cpad - Cout), (0, 0), (0, 0), (0, Cin_pad - Cin)))
    w2 = w2.reshape(Cpad, K).astype(jnp.bfloat16)                 # im2col weights

    b2 = jnp.pad(bias.astype(jnp.float32), (0, Cpad - Cout)).reshape(Cpad, 1)

    # --- VMEM budget guard (one whole image per grid step) ---
    vmem_est = (2 * Cin_pad * Sp * 4       # double-buffered input block
                + Cpad * K * 2             # weights (bf16)
                + 3 * K * L * 4            # im2col patches + temporaries
                + 3 * Cpad * L * 4)        # acc + double-buffered output block
    if vmem_est > int(0.75 * _VMEM_LIMIT_BYTES):
        # TODO(synk): add output-row tiling with a KH-1 halo for large H*W.
        raise ValueError(
            f"per-image working set ~{vmem_est} bytes exceeds the VMEM budget; "
            "row-tiling not implemented")

    add_bias = not has_bn   # per-channel bias cancels exactly in affine-free BN

    cparams = pltpu.CompilerParams(dimension_semantics=("parallel",),
                                   vmem_limit_bytes=_VMEM_LIMIT_BYTES)

    kernel1 = functools.partial(_conv_stats_kernel, KH=KH, KW=KW, Wp=Wp, Wo=Wo,
                                has_nonlinear=has_nonlinear, add_bias=add_bias)

    in_specs = [
        pl.BlockSpec((1, Cin_pad, Sp), lambda n: (n, 0, 0)),
        pl.BlockSpec((Cpad, K), lambda n: (0, 0)),
    ]
    args = [x_flat, w2]
    if add_bias:
        in_specs.append(pl.BlockSpec((Cpad, 1), lambda n: (0, 0)))
        args.append(b2)

    y, psum, psq = pl.pallas_call(
        kernel1,
        grid=(N,),
        in_specs=in_specs,
        out_specs=(
            pl.BlockSpec((1, Cpad, L), lambda n: (n, 0, 0)),
            pl.BlockSpec((1, Cpad, 1), lambda n: (n, 0, 0)),
            pl.BlockSpec((1, Cpad, 1), lambda n: (n, 0, 0)),
        ),
        out_shape=(
            jax.ShapeDtypeStruct((N, Cpad, L), jnp.float32),
            jax.ShapeDtypeStruct((N, Cpad, 1), jnp.float32),
            jax.ShapeDtypeStruct((N, Cpad, 1), jnp.float32),
        ),
        compiler_params=cparams,
    )(*args)

    if has_bn:
        # O(Cout) reduction of per-image partial stats (biased batch variance).
        count = N * Ho * Wo
        mean = jnp.sum(psum, axis=0) / count                      # (Cpad, 1)
        var = jnp.maximum(jnp.sum(psq, axis=0) / count - mean * mean, 0.0)
        scale = jax.lax.rsqrt(var + eps)
        shift = -mean * scale

        y = pl.pallas_call(
            _bn_apply_kernel,
            grid=(N,),
            in_specs=[
                pl.BlockSpec((1, Cpad, L), lambda n: (n, 0, 0)),
                pl.BlockSpec((Cpad, 1), lambda n: (0, 0)),
                pl.BlockSpec((Cpad, 1), lambda n: (0, 0)),
            ],
            out_specs=pl.BlockSpec((1, Cpad, L), lambda n: (n, 0, 0)),
            out_shape=jax.ShapeDtypeStruct((N, Cpad, L), jnp.float32),
            compiler_params=cparams,
        )(y, scale, shift)

    # Channel-major slab -> NCHW: drop channel padding and wrap-around columns.
    return y.reshape(N, Cpad, Ho, Wp)[:, :Cout, :, :Wo]


def _reference(x_nchw, w_oihw, bias, *, padding=0, has_nonlinear=True,
               has_bn=True, eps=1e-5, quantize_bf16=False):
    """Pure-JAX reference mirroring the PyTorch training-mode forward.

    quantize_bf16=True additionally rounds the matmul operands to bf16 (same
    as the kernel's MXU inputs) so that comparison isolates kernel-math error.
    """
    x = x_nchw.astype(jnp.float32)
    w = w_oihw.astype(jnp.float32)
    if has_nonlinear:
        x = jnp.maximum(x, 0.0)
    if quantize_bf16:
        x = x.astype(jnp.bfloat16).astype(jnp.float32)
        w = w.astype(jnp.bfloat16).astype(jnp.float32)
    y = jax.lax.conv_general_dilated(
        x, w, window_strides=(1, 1),
        padding=[(padding, padding), (padding, padding)],
        dimension_numbers=("NCHW", "OIHW", "NCHW"),
        precision=jax.lax.Precision.HIGHEST)
    y = y + bias.reshape(1, -1, 1, 1)
    if has_bn:
        mean = jnp.mean(y, axis=(0, 2, 3), keepdims=True)
        var = jnp.mean(jnp.square(y - mean), axis=(0, 2, 3), keepdims=True)
        y = (y - mean) * jax.lax.rsqrt(var + eps)
    return y


if __name__ == "__main__":
    # SubRCB(featIn=4, featOut=8, kerSize=3, stride=1, padding=0)
    feat_in, feat_out, ker = 4, 8, 3
    N, H, W = 2, 16, 16

    key = jax.random.PRNGKey(0)
    kx, kw, kb = jax.random.split(key, 3)

    x = jax.random.normal(kx, (N, feat_in, H, W), dtype=jnp.float32)

    # Deterministic Conv2d-style init: U(-bound, bound), bound = 1/sqrt(fan_in)
    fan_in = feat_in * ker * ker
    bound = 1.0 / (fan_in ** 0.5)
    w = jax.random.uniform(kw, (feat_out, feat_in, ker, ker),
                           minval=-bound, maxval=bound, dtype=jnp.float32)
    b = jax.random.uniform(kb, (feat_out,),
                           minval=-bound, maxval=bound, dtype=jnp.float32)

    out = jax.block_until_ready(subrcb_forward(x, w, b))

    Ho, Wo = H - ker + 1, W - ker + 1
    assert out.shape == (N, feat_out, Ho, Wo), out.shape

    # Tight check vs a reference with the same bf16 operand rounding as the MXU.
    ref_q = _reference(x, w, b, quantize_bf16=True)
    err_q = float(jnp.max(jnp.abs(out - ref_q)))
    assert jnp.allclose(out, ref_q, atol=1e-3, rtol=1e-3), err_q

    # Loose check vs the pure-f32 reference (bounds bf16 operand quantization).
    ref = _reference(x, w, b)
    err = float(jnp.max(jnp.abs(out - ref)))
    assert jnp.allclose(out, ref, atol=5e-2, rtol=5e-2), err

    print("KERNEL_OK")
</pallas_src>

<mosaic_0001>
module attributes {stable_mosaic.version = 11 : i64} {
  func.func @_conv_stats_kernel(%arg0: i32, %arg1: memref<1x8x258xf32, #tpu.memory_space<vmem>>, %arg2: memref<8x72xbf16, #tpu.memory_space<vmem>>, %arg3: memref<1x8x224xf32, #tpu.memory_space<vmem>>, %arg4: memref<1x8x1xf32, #tpu.memory_space<vmem>>, %arg5: memref<1x8x1xf32, #tpu.memory_space<vmem>>) attributes {dimension_semantics = [#tpu.dimension_semantics<parallel>], iteration_bounds = array<i64: 2>, scalar_prefetch = 0 : i64, scratch_operands = 0 : i64, tpu.core_type = #tpu.core_type<tc>, window_params = [{transform_indices = @transform_0, window_bounds = array<i64: 1, 8, 258>}, {pipeline_mode = #tpu.pipeline_mode<synchronous>, transform_indices = @transform_1, window_bounds = array<i64: 8, 72>}, {transform_indices = @transform_2, window_bounds = array<i64: 1, 8, 224>}, {transform_indices = @transform_3, window_bounds = array<i64: 1, 8, 1>}, {transform_indices = @transform_4, window_bounds = array<i64: 1, 8, 1>}]} {
    %c0 = arith.constant 0 : index
    %c0_0 = arith.constant 0 : index
    %c0_1 = arith.constant 0 : index
    %0 = vector.load %arg1[%c0, %c0_0, %c0_1] : memref<1x8x258xf32, #tpu.memory_space<vmem>>, vector<1x8x224xf32>
    %1 = vector.shape_cast %0 : vector<1x8x224xf32> to vector<8x224xf32>
    %c0_2 = arith.constant 0 : index
    %c0_3 = arith.constant 0 : index
    %c1 = arith.constant 1 : index
    %2 = vector.load %arg1[%c0_2, %c0_3, %c1] : memref<1x8x258xf32, #tpu.memory_space<vmem>>, vector<1x8x224xf32>
    %3 = vector.shape_cast %2 : vector<1x8x224xf32> to vector<8x224xf32>
    %c0_4 = arith.constant 0 : index
    %c0_5 = arith.constant 0 : index
    %c2 = arith.constant 2 : index
    %4 = vector.load %arg1[%c0_4, %c0_5, %c2] : memref<1x8x258xf32, #tpu.memory_space<vmem>>, vector<1x8x224xf32>
    %5 = vector.shape_cast %4 : vector<1x8x224xf32> to vector<8x224xf32>
    %c0_6 = arith.constant 0 : index
    %c0_7 = arith.constant 0 : index
    %c16 = arith.constant 16 : index
    %6 = vector.load %arg1[%c0_6, %c0_7, %c16] : memref<1x8x258xf32, #tpu.memory_space<vmem>>, vector<1x8x224xf32>
    %7 = vector.shape_cast %6 : vector<1x8x224xf32> to vector<8x224xf32>
    %c0_8 = arith.constant 0 : index
    %c0_9 = arith.constant 0 : index
    %c17 = arith.constant 17 : index
    %8 = vector.load %arg1[%c0_8, %c0_9, %c17] : memref<1x8x258xf32, #tpu.memory_space<vmem>>, vector<1x8x224xf32>
    %9 = vector.shape_cast %8 : vector<1x8x224xf32> to vector<8x224xf32>
    %c0_10 = arith.constant 0 : index
    %c0_11 = arith.constant 0 : index
    %c18 = arith.constant 18 : index
    %10 = vector.load %arg1[%c0_10, %c0_11, %c18] : memref<1x8x258xf32, #tpu.memory_space<vmem>>, vector<1x8x224xf32>
    %11 = vector.shape_cast %10 : vector<1x8x224xf32> to vector<8x224xf32>
    %c0_12 = arith.constant 0 : index
    %c0_13 = arith.constant 0 : index
    %c32 = arith.constant 32 : index
    %12 = vector.load %arg1[%c0_12, %c0_13, %c32] : memref<1x8x258xf32, #tpu.memory_space<vmem>>, vector<1x8x224xf32>
    %13 = vector.shape_cast %12 : vector<1x8x224xf32> to vector<8x224xf32>
    %c0_14 = arith.constant 0 : index
    %c0_15 = arith.constant 0 : index
    %c33 = arith.constant 33 : index
    %14 = vector.load %arg1[%c0_14, %c0_15, %c33] : memref<1x8x258xf32, #tpu.memory_space<vmem>>, vector<1x8x224xf32>
    %15 = vector.shape_cast %14 : vector<1x8x224xf32> to vector<8x224xf32>
    %c0_16 = arith.constant 0 : index
    %c0_17 = arith.constant 0 : index
    %c34 = arith.constant 34 : index
    %16 = vector.load %arg1[%c0_16, %c0_17, %c34] : memref<1x8x258xf32, #tpu.memory_space<vmem>>, vector<1x8x224xf32>
    %17 = vector.shape_cast %16 : vector<1x8x224xf32> to vector<8x224xf32>
    %18 = tpu.concatenate %1, %3, %5, %7, %9, %11, %13, %15, %17 in 0 : vector<8x224xf32>, vector<8x224xf32>, vector<8x224xf32>, vector<8x224xf32>, vector<8x224xf32>, vector<8x224xf32>, vector<8x224xf32>, vector<8x224xf32>, vector<8x224xf32> -> vector<72x224xf32>
    %cst = arith.constant 0.000000e+00 : f32
    %19 = vector.broadcast %cst : f32 to vector<72x224xf32>
    %20 = arith.maximumf %18, %19 : vector<72x224xf32>
    %c0_18 = arith.constant 0 : index
    %c0_19 = arith.constant 0 : index
    %21 = vector.load %arg2[%c0_18, %c0_19] : memref<8x72xbf16, #tpu.memory_space<vmem>>, vector<8x72xbf16>
    %22 = arith.truncf %20 : vector<72x224xf32> to vector<72x224xbf16>
    %cst_20 = arith.constant dense<0.000000e+00> : vector<8x224xf32>
    %23 = tpu.matmul %21, %22, %cst_20 {dimension_numbers = #tpu.dot_dimension_numbers<[1], [0], [0], [1], [0, 0, 1, 1], [], []>} : vector<8x72xbf16>, vector<72x224xbf16>, vector<8x224xf32> -> vector<8x224xf32>
    %c0_21 = arith.constant 0 : index
    %c0_22 = arith.constant 0 : index
    %c0_23 = arith.constant 0 : index
    %24 = vector.load %arg3[%c0_21, %c0_22, %c0_23] : memref<1x8x224xf32, #tpu.memory_space<vmem>>, vector<1x8x224xf32>
    %25 = vector.shape_cast %24 : vector<1x8x224xf32> to vector<8x224xf32>
    %26 = vector.shape_cast %23 : vector<8x224xf32> to vector<1x8x224xf32>
    tpu.vector_store %arg3[%c0_21, %c0_22, %c0_23], %26 {strides = array<i32>} : memref<1x8x224xf32, #tpu.memory_space<vmem>>, vector<1x8x224xf32>,
    %27 = tpu.iota {dimensions = array<i32: 1>} : vector<1x224xi32>
    %c16_i32 = arith.constant 16 : i32
    %c0_i32 = arith.constant 0 : i32
    %28 = arith.cmpi eq, %c16_i32, %c0_i32 : i32
    %c1_i32 = arith.constant 1 : i32
    %29 = arith.select %28, %c1_i32, %c16_i32 : i32
    %30 = vector.broadcast %29 : i32 to vector<1x224xi32>
    %31 = arith.remsi %27, %30 : vector<1x224xi32>
    %c0_i32_24 = arith.constant 0 : i32
    %32 = vector.broadcast %c0_i32_24 : i32 to vector<1x224xi32>
    %33 = arith.cmpi ne, %31, %32 : vector<1x224xi32>
    %c0_i32_25 = arith.constant 0 : i32
    %34 = vector.broadcast %c0_i32_25 : i32 to vector<1x224xi32>
    %35 = arith.cmpi slt, %31, %34 : vector<1x224xi32>
    %c0_i32_26 = arith.constant 0 : i32
    %36 = arith.cmpi slt, %29, %c0_i32_26 : i32
    %37 = vector.broadcast %36 : i1 to vector<1x224xi1>
    %38 = vector.broadcast %37 : vector<1x224xi1> to vector<1x224xi1>
    %39 = arith.xori %35, %38 : vector<1x224xi1>
    %40 = arith.andi %39, %33 : vector<1x224xi1>
    %41 = vector.broadcast %29 : i32 to vector<1x224xi32>
    %42 = arith.addi %31, %41 : vector<1x224xi32>
    %43 = arith.select %40, %42, %31 : vector<1x224xi1>, vector<1x224xi32>
    %c14_i32 = arith.constant 14 : i32
    %44 = vector.broadcast %c14_i32 : i32 to vector<1x224xi32>
    %45 = arith.cmpi slt, %43, %44 : vector<1x224xi32>
    %cst_27 = arith.constant 0.000000e+00 : f32
    %46 = vector.shape_cast %45 : vector<1x224xi1> to vector<1x224xi1>
    %47 = vector.broadcast %46 : vector<1x224xi1> to vector<8x224xi1>
    %48 = vector.broadcast %cst_27 : f32 to vector<8x224xf32>
    %49 = arith.select %47, %23, %48 : vector<8x224xi1>, vector<8x224xf32>
    %cst_28 = arith.constant dense<0.000000e+00> : vector<8xf32>
    %50 = vector.multi_reduction <add>, %49, %cst_28 [1] : vector<8x224xf32> to vector<8xf32>
    %51 = vector.shape_cast %50 : vector<8xf32> to vector<8x1xf32>
    %c0_29 = arith.constant 0 : index
    %c0_30 = arith.constant 0 : index
    %c0_31 = arith.constant 0 : index
    %52 = vector.load %arg4[%c0_29, %c0_30, %c0_31] : memref<1x8x1xf32, #tpu.memory_space<vmem>>, vector<1x8x1xf32>
    %53 = vector.shape_cast %52 : vector<1x8x1xf32> to vector<8x1xf32>
    %54 = vector.shape_cast %51 : vector<8x1xf32> to vector<1x8x1xf32>
    tpu.vector_store %arg4[%c0_29, %c0_30, %c0_31], %54 {strides = array<i32>} : memref<1x8x1xf32, #tpu.memory_space<vmem>>, vector<1x8x1xf32>,
    %55 = arith.mulf %49, %49 : vector<8x224xf32>
    %cst_32 = arith.constant dense<0.000000e+00> : vector<8xf32>
    %56 = vector.multi_reduction <add>, %55, %cst_32 [1] : vector<8x224xf32> to vector<8xf32>
    %57 = vector.shape_cast %56 : vector<8xf32> to vector<8x1xf32>
    %c0_33 = arith.constant 0 : index
    %c0_34 = arith.constant 0 : index
    %c0_35 = arith.constant 0 : index
    %58 = vector.load %arg5[%c0_33, %c0_34, %c0_35] : memref<1x8x1xf32, #tpu.memory_space<vmem>>, vector<1x8x1xf32>
    %59 = vector.shape_cast %58 : vector<1x8x1xf32> to vector<8x1xf32>
    %60 = vector.shape_cast %57 : vector<8x1xf32> to vector<1x8x1xf32>
    tpu.vector_store %arg5[%c0_33, %c0_34, %c0_35], %60 {strides = array<i32>} : memref<1x8x1xf32, #tpu.memory_space<vmem>>, vector<1x8x1xf32>,
    return
  }
  func.func @transform_0(%arg0: i32) -> (i32, i32, i32) {
    %c0_i32 = arith.constant 0 : i32
    %c0_i32_0 = arith.constant 0 : i32
    %c0_i32_1 = arith.constant 0 : i32
    return %arg0, %c0_i32, %c0_i32_0 : i32, i32, i32
  }
  func.func @transform_1(%arg0: i32) -> (i32, i32) {
    %c0_i32 = arith.constant 0 : i32
    %c0_i32_0 = arith.constant 0 : i32
    %c0_i32_1 = arith.constant 0 : i32
    return %c0_i32, %c0_i32_0 : i32, i32
  }
  func.func @transform_2(%arg0: i32) -> (i32, i32, i32) {
    %c0_i32 = arith.constant 0 : i32
    %c0_i32_0 = arith.constant 0 : i32
    %c0_i32_1 = arith.constant 0 : i32
    return %arg0, %c0_i32, %c0_i32_0 : i32, i32, i32
  }
  func.func @transform_3(%arg0: i32) -> (i32, i32, i32) {
    %c0_i32 = arith.constant 0 : i32
    %c0_i32_0 = arith.constant 0 : i32
    %c0_i32_1 = arith.constant 0 : i32
    return %arg0, %c0_i32, %c0_i32_0 : i32, i32, i32
  }
  func.func @transform_4(%arg0: i32) -> (i32, i32, i32) {
    %c0_i32 = arith.constant 0 : i32
    %c0_i32_0 = arith.constant 0 : i32
    %c0_i32_1 = arith.constant 0 : i32
    return %arg0, %c0_i32, %c0_i32_0 : i32, i32, i32
  }
}

</mosaic_0001>

<bundles_post_ra>
// kernel: tpu_custom_call.1
= control target key start
LH: loop header
LB: loop body
LE: loop exit
PB: predicated region body
PF: predicated region fallthrough
CT: control target
= control target key end

     0   :  { %10 = vsyncpa [#allocation3], 0  ;;  %s1118_s0 = inlined_call_operand.hbm [shape: f32[2,8,258], index: 0, kind: input, shape index: {}]   ;;  %s1119_s1 = inlined_call_operand.hbm [shape: bf16[8,72], index: 1, kind: input, shape index: {}]   ;;  %s1120_s2 = inlined_call_operand.hbm [shape: f32[2,8,224], index: 2, kind: output, shape index: {0}]   ;;  %s1121_s3 = inlined_call_operand.vmem [shape: f32[2,8,1], index: 3, kind: output, shape index: {1}]   ;;  %s1122_s4 = inlined_call_operand.vmem [shape: f32[2,8,1], index: 4, kind: output, shape index: {2}]  }
   0x1   :  { %12 = vsyncpa [#allocation3 + $0x1], 0 }
   0x2   :  { %13 = vsyncpa [#allocation6], 0 }
   0x3   :  { %14 = vsyncpa [#allocation4], 0 }
   0x4   :  { %16 = vsyncpa [#allocation4 + $0x1], 0  ;;  %s907_s15 = smov 0   ;;  %s909_s16 = smov 0  }
   0x5   :  { %s911_s17 = smov 0   ;;  %s913_s18 = smov 0  }
   0x6 LB: > { %s928_s19 = sadd.s32 4294967295, %s868_s18   ;;  %s613_s20 = sadd.s32 4294967294, %s868_s18   ;;  %s868_s18 = sphi %s913_s18, %s1146_s18   ;;  %s864_s17 = sphi %s911_s17, %s1145_s17   ;;  %s860_s16 = sphi %s909_s16, %s1144_s16   ;;  %s856_s15 = sphi %s907_s15, %s1143_s15  }
   0x7   : > { %p42_p0 = scmp.ne.s32.totalorder %s860_s16, %s856_s15  ;;  %p1123_p1 = scmp.eq.s32.totalorder %s928_s19, 0 }
   0x8   : > { %p93_p3 = scmp.eq.s32.totalorder %s613_s20, 1  ;;  %p614_p5 = scmp.ge.s32.totalorder %s868_s18, 1 }
   0x9   : > { %p937_p4 = por %p1123_p1, %p42_p0  ;;  %p152_p7 = scmp.lt.s32.totalorder %s868_s18, 3 }
   0xa   : > { %p942_p6 = por %p93_p3, %p42_p0  ;;  %s870_s24 = smov [#allocation5]  }
   0xb   : > { %s1126_s21 = scalar_select %p937_p4, 1, 0 }
   0xc   : > { %s1127_s22 = scalar_select %p942_p6, 1, 0 }
   0xd   : > { %p947_p8 = pnand %p614_p5, %p152_p7  ;;  %s165_s25 = sshll.u32 %s870_s24, 4  ;;  %s166_s25 = int_to_ptr.vmem [resolvable:$true] %s165_s25 }
   0xe   : > { %s955_s26 = sadd.s32 1, %s868_s18   ;;  %s29_s30 = sadd.s32 1, %s864_s17 }
   0xf   : > { %s1128_s23 = scalar_select %p947_p8, 1, 0 }
  0x10   : > { %p642_p10 = pneg %p947_p8  ;;  %s26_s28 = ssub.s32 %s868_s18, %s955_s26 }
  0x11   : > { %p965_p12 = scmp.eq.s32.totalorder %s26_s28, 0  ;;  %s740_s7 = scalar_lea.hbm %s1119_s1, 64 }
  0x12   : > { %p959_p11 = pnand %p642_p10, %p1123_p1  ;;  %p741_p0 = scmp.ne.s32.totalorder %s1119_s1, %s740_s7 }
  0x13   : > { %s1130_s29 = scalar_select %p965_p12, 1, 0 }
  0x14   : > { %p742_p3 = pneg %p959_p11  ;;  %p747_p10 = scmp.lt.u32.totalorder %s740_s7, %s1119_s1 }
  0x16   : > { %p743_p5 = pnand %p742_p3, %p741_p0 }
  0x18   : > { %p744_p7 = pneg %p743_p5 }
  0x1a   : > { %p749_p9 = pnand %p747_p10, %p744_p7 }
  0x1c   : > { %752 = shalt.err (!%p749_p9)
}
  0x1d   : > { %s753_s12 = scalar_lea.vmem %s166_s25, 64  ;;  %p761_p6 = scmp.lt.s32.totalorder %s166_s25, %s166_s25 }
  0x1e   : > { %p754_p1 = scmp.ne.s32.totalorder %s166_s25, %s753_s12  ;;  %p762_p4 = scmp.lt.s32.totalorder %s753_s12, %s753_s12 }
  0x20   : > { %p756_p2 = pnand %p754_p1, %p742_p3  ;;  %p763_p8 = por %p762_p4, %p761_p6 }
  0x22   : > { %p757_p13 = pneg %p756_p2 }
  0x24   : > { %p764_p12 = pnand %p763_p8, %p757_p13 }
  0x26   : > { %767 = shalt.err (!%p764_p12)
}
  0x27   : > { %645 = dma.hbm_to_vmem [thread:$0]  (!%p959_p11), %s1119_s1, 64, %s166_s25, [#allocation6]  }
  0x28   : > { %p1131_p1 = scmp.ne.s32.totalorder %s1130_s29, 0  ;;  %p37_p2 = scmp.eq.s32.totalorder %s868_s18, 0 }
  0x29   : > { %p1132_p4 = scmp.ne.s32.totalorder %s864_s17, %s860_s16  ;;  %p1133_p6 = scmp.eq.s32.totalorder %s928_s19, 1 }
  0x2a   : > { %s991_s20 = scalar_select %p1131_p1, %s864_s17, %s29_s30  }
  0x2b   : > { %p999_p8 = por %p1133_p6, %p1132_p4  ;;  %p655_p9 = scmp.lt.s32.totalorder %s868_s18, 2 }
  0x2c   : > { %s176_s27 = sand.u32 1, %s864_s17   ;;  %p1135_p12 = pmov %p1132_p4 }
  0x2d   : > { %s631_s28 = smul.u32 24, %s176_s27  ;;  %s177_s9 = scalar_lea.sflag [#allocation3], %s176_s27 }
  0x2e   : > { %p38_p13 = por %p37_p2, %p1135_p12  ;;  %s632_s5 = smul.u32 384, %s868_s18 }
  0x2f   : > { %s180_s7 = scalar_lea.vmem [#allocation2], %s631_s28  ;;  %s773_s13 = scalar_lea.hbm %s1118_s0, 768 }
  0x30   : > { %p1009_p0 = pnand %p655_p9, %p38_p13  ;;  %s1016_s30 = scalar_lea.hbm %s1118_s0, %s632_s5 }
  0x31   : > { %s188_s8 = sshll.u32 %s180_s7, 4  ;;  %s768_s10 = scalar_lea.hbm %s1016_s30, 384  ;;  %s1018_s8 = int_to_ptr.vmem [resolvable:$true] %s188_s8 }
  0x32   : > { %p769_p11 = scmp.ne.s32.totalorder %s1016_s30, %s768_s10  ;;  %p770_p3 = pneg %p1009_p0 }
  0x33   : > { %p774_p10 = scmp.lt.u32.totalorder %s1016_s30, %s1118_s0  ;;  %p775_p1 = scmp.lt.u32.totalorder %s773_s13, %s768_s10 }
  0x34   : > { %p771_p5 = pnand %p770_p3, %p769_p11  ;;  %p777_p4 = scmp.lt.u32.totalorder %s768_s10, %s1016_s30 }
  0x35   : > { %p776_p2 = por %p775_p1, %p774_p10 }
  0x36   : > { %p772_p7 = pneg %p771_p5 }
  0x37   : > { %p778_p6 = por %p777_p4, %p776_p2 }
  0x39   : > { %p779_p9 = pnand %p778_p6, %p772_p7 }
  0x3b   : > { %782 = shalt.err (!%p779_p9)
}
  0x3c   : > { %s783_s27 = scalar_lea.vmem %s1018_s8, 384  ;;  %s871_s28 = smov [#allocation2]  }
  0x3d   : > { %p784_p12 = scmp.ne.s32.totalorder %s1018_s8, %s783_s27  ;;  %s788_s25 = sshll.u32 %s871_s28, 4  ;;  %s789_s25 = int_to_ptr.vmem [resolvable:$false] %s788_s25 }
  0x3e   : > { %s790_s29 = scalar_lea.vmem %s789_s25, 768  ;;  %p791_p5 = scmp.lt.s32.totalorder %s1018_s8, %s789_s25 }
  0x3f   : > { %p786_p13 = pnand %p784_p12, %p770_p3  ;;  %p792_p10 = scmp.lt.s32.totalorder %s790_s29, %s783_s27 }
  0x41   : > { %p787_p11 = pneg %p786_p13  ;;  %p793_p1 = por %p792_p10, %p791_p5 }
  0x43   : > { %p794_p2 = pnand %p793_p1, %p787_p11 }
  0x45   : > { %797 = shalt.err (!%p794_p2)
}
  0x46   : > { %649 = dma.hbm_to_vmem [thread:$0]  (!%p1009_p0), %s1016_s30, 384, %s1018_s8, %s177_s9  }
  0x47   : > { %p1137_p7 = scmp.ne.s32.totalorder %s1128_s23, 0 }
  0x48   : > { %s1048_s7 = sand.u32 (!%p1137_p7), 1, %s860_s16   ;;  %p1138_p3 = scmp.ne.s32.totalorder (!%p1137_p7), %s1126_s21, 0 }
  0x49   : > { %197 = sbr.rel (%p1137_p7) target bundleno = 591 (0x24f), region = 28  ;;  %s200_s11 = scalar_lea.sflag (!%p1137_p7), [#allocation3], %s1048_s7 }
  0x4a   : > { %s633_s10 = smul.u32 (!%p1137_p7), 24, %s1048_s7 }
  0x4c   : > { %s203_s12 = scalar_lea.vmem (!%p1137_p7), [#allocation2], %s633_s10 }
  0x50   : > { %843 = dma.done.wait (%p1138_p3), %s200_s11, 384  }
  0x51   : > { %845 = vsyncadd (%p1138_p3), %s200_s11, 4294966912  ;;  %p1139_p4 = scmp.eq.s32.totalorder %s928_s19, 0 }
  0x53   : > { %847 = dma.done.wait (%p1139_p4), [#allocation6], 64   ;;  %p1140_p0 = pmov %p1139_p4 }
  0x54   : > { %v249_v0 = vld [vmem:[%s203_s12] sm:$0xff]  ;;  %v250_v1 = vld [vmem:[%s203_s12 + $0x8] sm:$0xff]  ;;  %s872_s23 = smov 112   ;;  %s873_s6 = smov 127   ;;  %v251_v3 = vld [vmem:[%s203_s12 + $0x10] sm:$0xff]  ;;  %v879_v5 = vmov 0  }
  0x55   : > { %849 = vsyncadd (%p1140_p0), [#allocation6], 4294967232  ;;  %v710_v2 = vpack.i.bf16 %v250_v1, %v249_v0  ;;  %s874_s30 = smov 111   ;;  %s875_s8 = smov 126   ;;  %v725_v4 = vpack.i.bf16 %v251_v3, %v250_v1  ;;  %397 = vmatprep.mubr.bf16.mxu0 %v879_v5  ;;  %vm258_vm0 = vcmask 1039360   ;;  %vm274_vm1 = vcmask 916480  }
  0x56   : > { %s876_s21 = smov 95   ;;  %s877_s9 = smov 110   ;;  %v326_v12 = vmax.f32 %v250_v1, 0.0  ;;  %v325_v13 = vmax.f32 %v249_v0, 0.0  ;;  %vm266_vm2 = vcmask 1031168   ;;  %vm282_vm3 = vcmask 908288  }
  0x57   : > { %711 = vrot.lane.b32.xlu1 %v710_v2, %s872_s23  ;;  %701 = vrot.lane.b32.xlu0 %v710_v2, %s873_s6  ;;  %s878_s13 = smov 96   ;;  %s880_s14 = smov 94   ;;  %vm309_vm4 = vcmask 777216   ;;  %vm290_vm5 = vcmask 900096   ;;  %vm298_vm6 = vcmask 785408   ;;  %vm320_vm7 = vcmask 769024  }
  0x58   : > { %vm358_vm8 = vcmask 1043456   ;;  %vm354_vm9 = vcmask 588800   ;;  %s620_s5 = sshll.u32 %s1048_s7, 4  ;;  %s630_s25 = sshll.u32 %s928_s19, 8 }
  0x59   : > { %s227_s27 = scalar_lea.vmem [#allocation7], %s620_s5  ;;  %s477_s11 = scalar_lea.hbm %s1120_s2, %s630_s25 }
  0x5a   : > { %s479_s28 = sshll.u32 %s227_s27, 4  ;;  %s457_s12 = scalar_lea.sflag [#allocation4], %s1048_s7  ;;  %s1069_s28 = int_to_ptr.vmem [resolvable:$true] %s479_s28 }
  0x5b   : > { %716 = vrot.lane.b32.xlu1 %v710_v2, %s874_s30  ;;  %706 = vrot.lane.b32.xlu0 %v710_v2, %s875_s8  ;;  %s798_s23 = scalar_lea.vmem %s1069_s28, 256  ;;  %s881_s6 = smov [#allocation7]  }
  0x5c   : > { %p799_p6 = scmp.ne.s32.totalorder %s1069_s28, %s798_s23  ;;  %s802_s30 = sshll.u32 %s881_s6, 4  ;;  %s803_s30 = int_to_ptr.vmem [resolvable:$false] %s802_s30 }
  0x5d   : > { %s804_s8 = scalar_lea.vmem %s803_s30, 512  ;;  %p805_p13 = scmp.lt.s32.totalorder %s1069_s28, %s803_s30 }
  0x5e   : > { %p800_p9 = pnand %p799_p6, %p999_p8  ;;  %p806_p11 = scmp.lt.s32.totalorder %s804_s8, %s798_s23 }
  0x5f   : > { %726 = vrot.lane.b32.xlu1 %v725_v4, %s876_s21  ;;  %721 = vrot.lane.b32.xlu0 %v710_v2, %s877_s9 }
  0x60   : > { %p801_p12 = pneg %p800_p9  ;;  %p807_p5 = por %p806_p11, %p805_p13 }
  0x62   : > { %p808_p10 = pnand %p807_p5, %p801_p12 }
  0x63   : > { %303 = vrot.lane.b32.xlu1 %v249_v0, %s876_s21  ;;  %731 = vrot.lane.b32.xlu0 %v710_v2, %s878_s13 }
  0x67   : > { %736 = vrot.lane.b32.xlu0 %v710_v2, %s880_s14  ;;  %318 = vrot.lane.b32.xlu1 %v251_v3, %s880_s14 }
  0xc9   : > { %v712_v6 = vpop.permute.xlu1 %711  ;;  %v702_v7 = vpop.permute.xlu0 %701 }
  0xca   : > { %v714_v8 = vunpack.i.h.bf16 %v712_v6  ;;  %v713_v9 = vunpack.i.l.bf16 %v712_v6  ;;  %v704_v10 = vunpack.i.h.bf16 %v702_v7  ;;  %v703_v11 = vunpack.i.l.bf16 %v702_v7  ;;  %v343_v7 = vld [vmem:[#allocation5] sm:$0xf] }
  0xcc   : > { %v328_v14 = vmax.f32 %v704_v10, 0.0  ;;  %v259_v15 = vsel %vm258_vm0, %v703_v11, %v704_v10  ;;  %v275_v19 = vsel %vm274_vm1, %v713_v9, %v714_v8  ;;  %v332_v28 = vmax.f32 %v714_v8, 0.0 }
  0xcd   : > { %v717_v16 = vpop.permute.xlu1 %716  ;;  %v707_v17 = vpop.permute.xlu0 %706  ;;  %v327_v18 = vmax.f32 %v259_v15, 0.0  ;;  %v331_v32 = vmax.f32 %v275_v19, 0.0  ;;  %v408_v8 = vlaneseq }
  0xce   : > { %v719_v20 = vunpack.i.h.bf16 %v717_v16  ;;  %v718_v21 = vunpack.i.l.bf16 %v717_v16  ;;  %v709_v22 = vunpack.i.h.bf16 %v707_v17  ;;  %v708_v23 = vunpack.i.l.bf16 %v707_v17 }
  0xcf   : > { %v345_v24 = vpack.c.bf16 %v328_v14, %v326_v12  ;;  %v344_v25 = vpack.c.bf16 %v327_v18, %v325_v13  ;;  %v409_v9 = vand.u32 127, %v408_v8 }
  0xd0   : > { %v330_v26 = vmax.f32 %v709_v22, 0.0  ;;  %v267_v27 = vsel %vm266_vm2, %v708_v23, %v709_v22  ;;  %v283_v33 = vsel %vm282_vm3, %v718_v21, %v719_v20  ;;  %v334_v40 = vmax.f32 %v719_v20, 0.0 }
  0xd1   : > { %365 = vmatprep.subr.bf16.mxu0 %v345_v24  ;;  %v727_v29 = vpop.permute.xlu1 %726  ;;  %v722_v30 = vpop.permute.xlu0 %721  ;;  %v329_v31 = vmax.f32 %v267_v27, 0.0  ;;  %v333_v46 = vmax.f32 %v283_v33, 0.0  ;;  %v410_v10 = vadd.s32 128, %v409_v9  ;;  %v415_v11 = vand.u32 15, %v409_v9 }
  0xd2   : > { %v729_v34 = vunpack.i.h.bf16 %v727_v29  ;;  %v728_v35 = vunpack.i.l.bf16 %v727_v29  ;;  %v724_v36 = vunpack.i.h.bf16 %v722_v30  ;;  %v723_v37 = vunpack.i.l.bf16 %v722_v30  ;;  %366 = vmatpush1.bf16.msra.mxu0 %v344_v25 }
  0xd3   : > { %v347_v38 = vpack.c.bf16 %v332_v28, %v330_v26  ;;  %v346_v39 = vpack.c.bf16 %v331_v32, %v329_v31  ;;  %v422_v12 = vand.u32 15, %v410_v10  ;;  %vm435_vm10 = vcmp.lt.s32.totalorder %v415_v11, 14 }
  0xd4   : > { %v336_v41 = vmax.f32 %v724_v36, 0.0  ;;  %v291_v42 = vsel %vm290_vm5, %v723_v37, %v724_v36  ;;  %v311_v43 = vsel %vm309_vm4, %v728_v35, %v729_v34 }
  0xd5   : > { %367 = vmatprep.subr.bf16.mxu0 %v347_v38  ;;  %v304_v44 = vpop.permute.xlu1 %303  ;;  %v732_v45 = vpop.permute.xlu0 %731  ;;  %v335_v47 = vmax.f32 %v291_v42, 0.0  ;;  %v340_v48 = vmax.f32 %v311_v43, 0.0  ;;  %vm436_vm11 = vcmp.lt.s32.totalorder %v422_v12, 14 }
  0xd6   : > { %v310_v49 = vsel %vm309_vm4, %v304_v44, %v728_v35  ;;  %v734_v50 = vunpack.i.h.bf16 %v732_v45  ;;  %v733_v51 = vunpack.i.l.bf16 %v732_v45  ;;  %368 = vmatpush1.bf16.msra.mxu0 %v346_v39  ;;  %v349_v52 = vpack.c.bf16 %v336_v41, %v334_v40 }
  0xd7   : > { %v348_v53 = vpack.c.bf16 %v335_v47, %v333_v46  ;;  %v339_v56 = vmax.f32 %v310_v49, 0.0 }
  0xd8   : > { %v338_v54 = vmax.f32 %v734_v50, 0.0  ;;  %369 = vmatprep.subr.bf16.mxu0 %v349_v52  ;;  %v299_v55 = vsel %vm298_vm6, %v733_v51, %v734_v50 }
  0xd9   : > { %v737_v57 = vpop.permute.xlu0 %736  ;;  %v319_v58 = vpop.permute.xlu1 %318  ;;  %v337_v59 = vmax.f32 %v299_v55, 0.0 }
  0xda   : > { %v739_v60 = vunpack.i.h.bf16 %v737_v57  ;;  %v738_v61 = vunpack.i.l.bf16 %v737_v57  ;;  %370 = vmatpush1.bf16.msra.mxu0 %v348_v53  ;;  %v351_v62 = vpack.c.bf16 %v340_v48, %v338_v54 }
  0xdb   : > { %v350_v63 = vpack.c.bf16 %v339_v56, %v337_v59 }
  0xdc   : > { %v322_v0 = vsel %vm320_vm7, %v739_v60, %v319_v58  ;;  %371 = vmatprep.subr.bf16.mxu0 %v351_v62  ;;  %v321_v1 = vsel %vm320_vm7, %v738_v61, %v739_v60 }
  0xdd   : > { %v342_v2 = vmax.f32 %v322_v0, 0.0  ;;  %v341_v3 = vmax.f32 %v321_v1, 0.0 }
  0xde   : > { %372 = vmatpush1.bf16.msra.mxu0 %v350_v63 }
  0xdf   : > { %v353_v4 = vpack.c.bf16 %v342_v2, %v342_v2  ;;  %v352_v5 = vpack.c.bf16 %v341_v3, %v341_v3 }
  0xe1   : > { %623 = vmatprep.subr.msk.bf16.mxu0 %vm358_vm8, %v353_v4  ;;  %v360_v6 = vsel %vm358_vm8, %v352_v5, 0 }
  0xe2   : > { %374 = vmatpush1.bf16.msra.mxu0 %v360_v6 }
  0xe5   : > { %624 = vmatmul.mubr.msk.bf16.vlgmr.msra.gmra.mrb[0].mxu0 %vm354_vm9, %v343_v7 }
 0x1b8   : > { %v399_v13 = vpop.f32.mrb[0].mxu0 }
 0x1b9   : > { %406 = vst [vmem:[%s227_s27] sm:$0xff] %v399_v13  ;;  %v441_v14 = vsel %vm435_vm10, %v399_v13, 0.0  ;;  %v401_v15 = vpop.f32.mrb[1].mxu0 }
 0x1ba   : > { %407 = vst.msk [vmem:[%s227_s27 + $0x8] sm:$0xff] %vm298_vm6, %v401_v15  ;;  %v442_v16 = vsel %vm436_vm11, %v401_v15, 0.0  ;;  %v403_v17 = vpop.f32.mrb[2].mxu0  ;;  %v449_v21 = vmul.f32 %v441_v14, %v441_v14 }
 0x1bb   : > { %v450_v18 = vmul.f32 %v442_v16, %v442_v16  ;;  %v404_v19 = vpop.f32.mrb[3].mxu0  ;;  %v443_v20 = vsel %vm298_vm6, %v442_v16, 0.0 }
 0x1bc   : > { %v444_v22 = vadd.f32 %v443_v20, %v441_v14 }
 0x1bd   : > { %v451_v23 = vsel %vm298_vm6, %v450_v18, 0.0 }
 0x1be   : > { %445 = vadd.xlane.f32.xlu0 %v444_v22  ;;  %v452_v24 = vadd.f32 %v451_v23, %v449_v21 }
 0x1c0   : > { %453 = vadd.xlane.f32.xlu1 %v452_v24 }
 0x1c1   : > { %811 = shalt.err (!%p808_p10)
}
 0x1c2   : > { %s812_s21 = scalar_lea.hbm %s477_s11, 256  ;;  %s816_s13 = scalar_lea.hbm %s1120_s2, 512 }
 0x1c3   : > { %p813_p1 = scmp.ne.s32.totalorder %s477_s11, %s812_s21  ;;  %p817_p3 = scmp.lt.u32.totalorder %s477_s11, %s1120_s2 }
 0x1c4   : > { %p818_p4 = scmp.lt.u32.totalorder %s816_s13, %s812_s21  ;;  %p820_p6 = scmp.lt.u32.totalorder %s812_s21, %s477_s11 }
 0x1c5   : > { %p814_p2 = pnand %p813_p1, %p999_p8 }
 0x1c6   : > { %p819_p0 = por %p818_p4, %p817_p3 }
 0x1c7   : > { %p815_p7 = pneg %p814_p2 }
 0x1c8   : > { %p821_p9 = por %p820_p6, %p819_p0 }
 0x1ca   : > { %p822_p12 = pnand %p821_p9, %p815_p7 }
 0x1cc   : > { %825 = shalt.err (!%p822_p12)
}
 0x1cd   : > { %640 = dma.vmem_to_hbm [thread:$0]  (%p999_p8), %s1069_s28, 256, %s477_s11, %s457_s12   ;;  %vm447_vm12 = vcmask 7168  }
 0x1ce   : > { %p240_p13 = scmp.lt.s32.totalorder %s928_s19, 1 }
 0x1d0   : > { %s1148_s19 = smov (!%p240_p13, %s928_s19), 1 }
 0x1d1   : > { %s621_s27 = sshll.u32 %s1148_s19, 3 }
 0x1d2   : > { %s243_s10 = scalar_lea.vmem %s1121_s3, %s621_s27  ;;  %s247_s30 = scalar_lea.vmem %s1122_s4, %s621_s27 }
 0x24b   : > { %v446_v25 = vpop.xlane.xlu0 %445 }
 0x24c   : > { %448 = vst.msk [vmem:[%s243_s10] sm:$0xff] %vm447_vm12, %v446_v25 }
 0x24d   : > { %v454_v26 = vpop.xlane.xlu1 %453 }
 0x24e   : > { %455 = vst.msk [vmem:[%s247_s30] sm:$0xff] %vm447_vm12, %v454_v26 }
 0x24f PF: > { %s497_s24 = sand.u32 1, %s856_s15   ;;  %p1141_p8 = scmp.ne.s32.totalorder %s1127_s22, 0 }
 0x250   : > { %p1142_p11 = scmp.ge.s32.totalorder %s868_s18, 2  ;;  %s498_s19 = scalar_lea.sflag [#allocation4], %s497_s24 }
 0x252   : > { %p651_p5 = pnand %p1142_p11, %p1141_p8 }
 0x254   : > { %851 = dma.done.wait (!%p651_p5), %s498_s19, 256  }
 0x255   : > { %853 = vsyncadd (!%p651_p5), %s498_s19, 4294967040  ;;  %p19_p10 = scmp.ge.s32.totalorder %s955_s26, 4   ;;  %s1143_s15 = smov %s860_s16 }
 0x256   : > { %s1144_s16 = smov %s864_s17  ;;  %s1145_s17 = smov %s991_s20 }
 0x257   : > { %s1146_s18 = smov %s955_s26  ;;  %21 = sbr.rel (!%p19_p10) target bundleno = 6 (0x6), region = 101 }
 0x25e   :  { %517 = vsyncpa [#allocation3], 1 }
 0x25f   :  { %519 = vsyncpa [#allocation3 + $0x1], 1 }
 0x260   :  { %520 = vsyncpa [#allocation6], 1 }
 0x261   :  { %521 = vsyncpa [#allocation4], 1 }
 0x262   :  { %523 = vsyncpa [#allocation4 + $0x1], 1 }

</bundles_post_ra>
